<compile_context>
chip_gen: v6e
topology: v6e:2x2x1
jax: 0.10.0
libtpu: 0.0.40
codegen_flags: <defaults>
</compile_context>

<pallas_src>
import jax
import jax.numpy as jnp
from jax.experimental import pallas as pl
from jax.experimental.pallas import tpu as pltpu


def _make_conv_kernel(NB, Ho, KD, W2C4):
    """Fused im2col (row-tap gather) + single fat-K matmul for NB images."""

    def kernel(x_ref, w_ref, b_ref, o_ref, xg_ref):
        # x_ref : (NB, H2, W2*C4)       f32  lane-dense space-to-depth input block
        # w_ref : (KD*W2*C4, Wo*O)      f32  block-Toeplitz weights (dh, dw folded into K)
        # b_ref : (1, Wo*O)             f32  bias tiled over Wo
        # o_ref : (NB*Ho, Wo*O)         f32  sublane+lane dense output block
        # xg_ref: (NB*Ho, KD*W2*C4)     f32  VMEM scratch: gathered row taps
        for dh in range(KD):  # KD=5 static taps: lane-dense 128-wide slab copies
            xg_ref[:, dh * W2C4:(dh + 1) * W2C4] = (
                x_ref[:, dh:dh + Ho, :].reshape(NB * Ho, W2C4))
        acc = jnp.dot(xg_ref[...], w_ref[...],
                      preferred_element_type=jnp.float32)
        o_ref[...] = (acc + b_ref[...]).astype(o_ref.dtype)

    return kernel


def conv_unit_forward(x_nchw, weight_oihw, bias, stride=2):
    """Equivalent to nn.Conv2d(C, O, kernel_size=9, stride=2, bias=True)(x_nchw)."""
    N, C, H, W = x_nchw.shape
    O, Cw, kH, kW = weight_oihw.shape
    assert C == Cw, "channel mismatch"
    assert kH == kW, "square kernel expected"
    Ho = (H - kH) // stride + 1
    Wo = (W - kW) // stride + 1

    KD = -(-kH // stride)              # taps per axis in space-to-depth space
    C4 = C * stride * stride           # s2d channel count

    # --- glue: pad spatial dims to a multiple of stride, then space-to-depth ---
    Hp = -(-H // stride) * stride
    Wp = -(-W // stride) * stride
    H2, W2 = Hp // stride, Wp // stride
    assert Ho + KD - 1 <= H2 and Wo + KD - 1 <= W2
    W2C4 = W2 * C4

    dtype = jnp.float32
    xp = jnp.pad(x_nchw.astype(dtype), ((0, 0), (0, 0), (0, Hp - H), (0, Wp - W)))
    # (N,C,H,W) -> (N, H2, W2*C4), channel order within C4 = (ph, pw, c); lane-dense.
    x_s2d = xp.reshape(N, C, H2, stride, W2, stride)
    x_s2d = jnp.transpose(x_s2d, (0, 2, 4, 3, 5, 1)).reshape(N, H2, W2C4)
    # TODO(synk): the space-to-depth relayout costs one extra HBM read+write of the
    # input; it could be folded into the kernel with a strided manual DMA.

    # weights: OIHW -> zero-pad taps to (KD*stride)^2 -> (KD, KD, C4, O), s2d channel order
    wp = jnp.pad(weight_oihw.astype(dtype),
                 ((0, 0), (0, 0), (0, KD * stride - kH), (0, KD * stride - kW)))
    w_s2d = wp.reshape(O, C, KD, stride, KD, stride)
    w_s2d = jnp.transpose(w_s2d, (2, 4, 3, 5, 1, 0)).reshape(KD, KD, C4, O)

    # Fold dw into K via a block-Toeplitz layout along W2, stack dh taps:
    #   w_gemm[(dh*W2 + w)*C4 + c, wo*O + o] = w_s2d[dh, w - wo, c, o]  (0 elsewhere)
    w_toe = jnp.zeros((KD, W2, C4, Wo, O), dtype)
    for wo in range(Wo):
        w_toe = w_toe.at[:, wo:wo + KD, :, wo, :].set(w_s2d)
    w_gemm = w_toe.reshape(KD * W2C4, Wo * O)

    b_gemm = jnp.tile(bias.astype(dtype), Wo).reshape(1, Wo * O)

    # Batch NB images per grid step so M = NB*Ho fills MXU rows; toy N=2 -> one step.
    NB = 1
    for cand in range(N, 0, -1):
        if N % cand == 0 and cand * Ho <= 512:
            NB = cand
            break
    grid = (N // NB,)

    kernel = _make_conv_kernel(NB, Ho, KD, W2C4)

    out_flat = pl.pallas_call(
        kernel,
        out_shape=jax.ShapeDtypeStruct((N * Ho, Wo * O), jnp.float32),
        grid=grid,
        in_specs=[
            pl.BlockSpec((NB, H2, W2C4), lambda i: (i, 0, 0)),      # streamed image block
            pl.BlockSpec((KD * W2C4, Wo * O), lambda i: (0, 0)),    # VMEM-resident weights
            pl.BlockSpec((1, Wo * O), lambda i: (0, 0)),            # VMEM-resident bias
        ],
        out_specs=pl.BlockSpec((NB * Ho, Wo * O), lambda i: (i, 0)),
        scratch_shapes=[pltpu.VMEM((NB * Ho, KD * W2C4), jnp.float32)],
        compiler_params=pltpu.CompilerParams(
            dimension_semantics=("parallel",)),
        cost_estimate=pl.CostEstimate(
            flops=2 * (N * Ho) * (KD * W2C4) * (Wo * O),   # matches issued MACs
            bytes_accessed=4 * (x_s2d.size + w_gemm.size + b_gemm.size
                                + N * Ho * Wo * O),
            transcendentals=0),
    )(x_s2d, w_gemm, b_gemm)

    out = out_flat.reshape(N, Ho, Wo, O)
    # TODO(synk): if the consumer takes NHWC, return `out` directly and save this
    # full read+write of the output (kept to match the PyTorch NCHW contract).
    return jnp.transpose(out, (0, 3, 1, 2)).astype(x_nchw.dtype)


if __name__ == "__main__":
    key = jax.random.PRNGKey(0)
    k_x, k_w, k_b = jax.random.split(key, 3)

    # Small shapes consistent with the module: batch=2, in_channels=4, spatial=16
    N, C, H, W = 2, 4, 16, 16
    O, kH, kW, stride = 32, 9, 9, 2

    x = jax.random.normal(k_x, (N, C, H, W), dtype=jnp.float32)

    # Deterministic parameter init (PyTorch-default-like uniform bounds)
    fan_in = C * kH * kW
    bound = 1.0 / jnp.sqrt(jnp.float32(fan_in))
    weight = jax.random.uniform(k_w, (O, C, kH, kW), minval=-bound, maxval=bound,
                                dtype=jnp.float32)
    bias = jax.random.uniform(k_b, (O,), minval=-bound, maxval=bound,
                              dtype=jnp.float32)

    y = conv_unit_forward(x, weight, bias, stride=stride)
    y = jax.block_until_ready(y)

    # Reference: XLA's native convolution in full f32.
    ref = jax.lax.conv_general_dilated(
        x, weight, window_strides=(stride, stride), padding="VALID",
        dimension_numbers=("NCHW", "OIHW", "NCHW"),
        precision=jax.lax.Precision.HIGHEST,
    ) + bias.reshape(1, O, 1, 1)

    Hout = (H - kH) // stride + 1
    Wout = (W - kW) // stride + 1
    assert y.shape == (N, O, Hout, Wout), y.shape
    max_err = float(jnp.max(jnp.abs(y - ref)))
    # f32 operands with f32 MXU accumulation: typically ~1e-6; bound is conservative.
    assert max_err < 3e-3, f"mismatch vs reference conv: max abs err {max_err}"

    print("KERNEL_OK")
</pallas_src>

<mosaic_0001>
module attributes {stable_mosaic.version = 11 : i64} {
  func.func @kernel(%arg0: i32, %arg1: memref<2x8x128xf32, #tpu.memory_space<vmem>>, %arg2: memref<640x128xf32, #tpu.memory_space<vmem>>, %arg3: memref<1x128xf32, #tpu.memory_space<vmem>>, %arg4: memref<8x128xf32, #tpu.memory_space<vmem>>, %arg5: memref<8x640xf32, #tpu.memory_space<vmem>>) attributes {dimension_semantics = [#tpu.dimension_semantics<parallel>], iteration_bounds = array<i64: 1>, scalar_prefetch = 0 : i64, scratch_operands = 1 : i64, tpu.core_type = #tpu.core_type<tc>, window_params = [{transform_indices = @transform_0, window_bounds = array<i64: 2, 8, 128>}, {pipeline_mode = #tpu.pipeline_mode<synchronous>, transform_indices = @transform_1, window_bounds = array<i64: 640, 128>}, {pipeline_mode = #tpu.pipeline_mode<synchronous>, transform_indices = @transform_2, window_bounds = array<i64: 1, 128>}, {transform_indices = @transform_3, window_bounds = array<i64: 8, 128>}]} {
    %c0 = arith.constant 0 : index
    %c0_0 = arith.constant 0 : index
    %c0_1 = arith.constant 0 : index
    %0 = vector.load %arg1[%c0, %c0_0, %c0_1] : memref<2x8x128xf32, #tpu.memory_space<vmem>>, vector<2x4x128xf32>
    %1 = vector.shape_cast %0 : vector<2x4x128xf32> to vector<8x128xf32>
    %c0_2 = arith.constant 0 : index
    %c0_3 = arith.constant 0 : index
    %2 = vector.load %arg5[%c0_2, %c0_3] : memref<8x640xf32, #tpu.memory_space<vmem>>, vector<8x128xf32>
    tpu.vector_store %arg5[%c0_2, %c0_3], %1 {strides = array<i32>} : memref<8x640xf32, #tpu.memory_space<vmem>>, vector<8x128xf32>,
    %c0_4 = arith.constant 0 : index
    %c1 = arith.constant 1 : index
    %c0_5 = arith.constant 0 : index
    %3 = vector.load %arg1[%c0_4, %c1, %c0_5] : memref<2x8x128xf32, #tpu.memory_space<vmem>>, vector<2x4x128xf32>
    %4 = vector.shape_cast %3 : vector<2x4x128xf32> to vector<8x128xf32>
    %c0_6 = arith.constant 0 : index
    %c128 = arith.constant 128 : index
    %5 = vector.load %arg5[%c0_6, %c128] : memref<8x640xf32, #tpu.memory_space<vmem>>, vector<8x128xf32>
    tpu.vector_store %arg5[%c0_6, %c128], %4 {strides = array<i32>} : memref<8x640xf32, #tpu.memory_space<vmem>>, vector<8x128xf32>,
    %c0_7 = arith.constant 0 : index
    %c2 = arith.constant 2 : index
    %c0_8 = arith.constant 0 : index
    %6 = vector.load %arg1[%c0_7, %c2, %c0_8] : memref<2x8x128xf32, #tpu.memory_space<vmem>>, vector<2x4x128xf32>
    %7 = vector.shape_cast %6 : vector<2x4x128xf32> to vector<8x128xf32>
    %c0_9 = arith.constant 0 : index
    %c256 = arith.constant 256 : index
    %8 = vector.load %arg5[%c0_9, %c256] : memref<8x640xf32, #tpu.memory_space<vmem>>, vector<8x128xf32>
    tpu.vector_store %arg5[%c0_9, %c256], %7 {strides = array<i32>} : memref<8x640xf32, #tpu.memory_space<vmem>>, vector<8x128xf32>,
    %c0_10 = arith.constant 0 : index
    %c3 = arith.constant 3 : index
    %c0_11 = arith.constant 0 : index
    %9 = vector.load %arg1[%c0_10, %c3, %c0_11] : memref<2x8x128xf32, #tpu.memory_space<vmem>>, vector<2x4x128xf32>
    %10 = vector.shape_cast %9 : vector<2x4x128xf32> to vector<8x128xf32>
    %c0_12 = arith.constant 0 : index
    %c384 = arith.constant 384 : index
    %11 = vector.load %arg5[%c0_12, %c384] : memref<8x640xf32, #tpu.memory_space<vmem>>, vector<8x128xf32>
    tpu.vector_store %arg5[%c0_12, %c384], %10 {strides = array<i32>} : memref<8x640xf32, #tpu.memory_space<vmem>>, vector<8x128xf32>,
    %c0_13 = arith.constant 0 : index
    %c4 = arith.constant 4 : index
    %c0_14 = arith.constant 0 : index
    %12 = vector.load %arg1[%c0_13, %c4, %c0_14] : memref<2x8x128xf32, #tpu.memory_space<vmem>>, vector<2x4x128xf32>
    %13 = vector.shape_cast %12 : vector<2x4x128xf32> to vector<8x128xf32>
    %c0_15 = arith.constant 0 : index
    %c512 = arith.constant 512 : index
    %14 = vector.load %arg5[%c0_15, %c512] : memref<8x640xf32, #tpu.memory_space<vmem>>, vector<8x128xf32>
    tpu.vector_store %arg5[%c0_15, %c512], %13 {strides = array<i32>} : memref<8x640xf32, #tpu.memory_space<vmem>>, vector<8x128xf32>,
    %c0_16 = arith.constant 0 : index
    %c0_17 = arith.constant 0 : index
    %15 = vector.load %arg5[%c0_16, %c0_17] : memref<8x640xf32, #tpu.memory_space<vmem>>, vector<8x640xf32>
    %c0_18 = arith.constant 0 : index
    %c0_19 = arith.constant 0 : index
    %16 = vector.load %arg2[%c0_18, %c0_19] : memref<640x128xf32, #tpu.memory_space<vmem>>, vector<640x128xf32>
    %cst = arith.constant dense<0.000000e+00> : vector<8x128xf32>
    %17 = tpu.matmul %15, %16, %cst {dimension_numbers = #tpu.dot_dimension_numbers<[1], [0], [0], [1], [0, 0, 1, 1], [], []>} : vector<8x640xf32>, vector<640x128xf32>, vector<8x128xf32> -> vector<8x128xf32>
    %c0_20 = arith.constant 0 : index
    %c0_21 = arith.constant 0 : index
    %18 = vector.load %arg3[%c0_20, %c0_21] : memref<1x128xf32, #tpu.memory_space<vmem>>, vector<1x128xf32>
    %19 = vector.broadcast %18 : vector<1x128xf32> to vector<8x128xf32>
    %20 = arith.addf %17, %19 : vector<8x128xf32>
    %c0_22 = arith.constant 0 : index
    %c0_23 = arith.constant 0 : index
    %21 = vector.load %arg4[%c0_22, %c0_23] : memref<8x128xf32, #tpu.memory_space<vmem>>, vector<8x128xf32>
    tpu.vector_store %arg4[%c0_22, %c0_23], %20 {strides = array<i32>} : memref<8x128xf32, #tpu.memory_space<vmem>>, vector<8x128xf32>,
    return
  }
  func.func @transform_0(%arg0: i32) -> (i32, i32, i32) {
    %c0_i32 = arith.constant 0 : i32
    %c0_i32_0 = arith.constant 0 : i32
    %c0_i32_1 = arith.constant 0 : i32
    return %arg0, %c0_i32, %c0_i32_0 : i32, i32, i32
  }
  func.func @transform_1(%arg0: i32) -> (i32, i32) {
    %c0_i32 = arith.constant 0 : i32
    %c0_i32_0 = arith.constant 0 : i32
    %c0_i32_1 = arith.constant 0 : i32
    return %c0_i32, %c0_i32_0 : i32, i32
  }
  func.func @transform_2(%arg0: i32) -> (i32, i32) {
    %c0_i32 = arith.constant 0 : i32
    %c0_i32_0 = arith.constant 0 : i32
    %c0_i32_1 = arith.constant 0 : i32
    return %c0_i32, %c0_i32_0 : i32, i32
  }
  func.func @transform_3(%arg0: i32) -> (i32, i32) {
    %c0_i32 = arith.constant 0 : i32
    %c0_i32_0 = arith.constant 0 : i32
    return %arg0, %c0_i32 : i32, i32
  }
}

</mosaic_0001>

<bundles_post_ra>
// kernel: tpu_custom_call.1
= control target key start
LH: loop header
LB: loop body
LE: loop exit
PB: predicated region body
PF: predicated region fallthrough
CT: control target
= control target key end

     0   :  { %8 = vsyncpa [#allocation4], 0  ;;  %s637_s0 = inlined_call_operand.hbm [shape: f32[2,8,128], index: 0, kind: input, shape index: {}]   ;;  %s638_s1 = inlined_call_operand.hbm [shape: f32[640,128], index: 1, kind: input, shape index: {}]   ;;  %s639_s2 = inlined_call_operand.vmem [shape: f32[1,128], index: 2, kind: input, shape index: {}]   ;;  %s640_s3 = inlined_call_operand.hbm [shape: f32[8,128], index: 3, kind: output, shape index: {}]  }
   0x1   :  { %9 = vsyncpa [#allocation7], 0 }
   0x2   :  { %10 = vsyncpa [#allocation5], 0  ;;  %s598_s12 = smov [#allocation3]  }
   0x3   :  { %s16_s13 = sshll.u32 %s598_s12, 4  ;;  %s17_s13 = int_to_ptr.vmem [resolvable:$true] %s16_s13 }
   0x4   :  { %s540_s14 = scalar_lea.vmem %s17_s13, 256  ;;  %p545_p1 = scmp.lt.s32.totalorder %s17_s13, %s17_s13 }
   0x5   :  { %p541_p0 = scmp.ne.s32.totalorder %s17_s13, %s540_s14  ;;  %p546_p2 = scmp.lt.s32.totalorder %s540_s14, %s540_s14 }
   0x7   :  { %p547_p3 = por %p546_p2, %p545_p1 }
   0x9   :  { %p548_p4 = pnand %p547_p3, %p541_p0 }
   0xb   :  { %551 = shalt.err (!%p548_p4)
}
   0xc   :  { %s599_s15 = smov 128   ;;  %s600_s16 = smov 8  }
   0xd   :  { %22 = dma.hbm_to_vmem [thread:$0]  %s637_s0, 256, %s17_s13, [#allocation4], %s599_s15, %s599_s15, %s600_s16  }
   0xe   :  { %s601_s19 = smov [#allocation6]  }
   0xf   :  { %s28_s20 = sshll.u32 %s601_s19, 4  ;;  %s29_s20 = int_to_ptr.vmem [resolvable:$true] %s28_s20 }
  0x10   :  { %s560_s21 = scalar_lea.vmem %s29_s20, 10240  ;;  %p565_p6 = scmp.lt.s32.totalorder %s29_s20, %s29_s20 }
  0x11   :  { %p561_p5 = scmp.ne.s32.totalorder %s29_s20, %s560_s21  ;;  %p566_p7 = scmp.lt.s32.totalorder %s560_s21, %s560_s21 }
  0x13   :  { %p567_p8 = por %p566_p7, %p565_p6 }
  0x15   :  { %p568_p9 = pnand %p567_p8, %p561_p5 }
  0x17   :  { %571 = shalt.err (!%p568_p9)
}
  0x18   :  { %34 = dma.hbm_to_vmem [thread:$0]  %s638_s1, 10240, %s29_s20, [#allocation7], %s599_s15, %s599_s15, %s600_s16  }
  0x19   :  { %592 = dma.done.wait [#allocation4], 256  }
  0x1a   :  { %593 = vsyncadd [#allocation4], 4294967040 }
  0x1b   :  { %594 = dma.done.wait [#allocation7], 10240  }
  0x1c   :  { %595 = vsyncadd [#allocation7], 4294957056  ;;  %v114_v0 = vld [vmem:[#allocation6 + $0xf8] sm:$0xff]  ;;  %v113_v2 = vld [vmem:[#allocation6 + $0xf0] sm:$0xff]  ;;  %vm603_vm0 = vmmov 0   ;;  %s604_s24 = smov [#allocation8]  }
  0x1d   :  { %v98_v1 = vld [vmem:[#allocation6 + $0x78] sm:$0xff]  ;;  %398 = vmatprep.subr.mxu0 %v114_v0  ;;  %v97_v4 = vld [vmem:[#allocation6 + $0x70] sm:$0xff]  ;;  %v112_v6 = vld [vmem:[#allocation6 + $0xe8] sm:$0xff]  ;;  %s387_s25 = sshll.u32 %s604_s24, 4  ;;  %s388_s25 = int_to_ptr.vmem [resolvable:$true] %s387_s25 }
  0x1e   :  { %v146_v3 = vld [vmem:[#allocation6 + $0x1f8] sm:$0xff]  ;;  %399 = vmatpush3.msra.mxu0 %v98_v1  ;;  %v145_v7 = vld [vmem:[#allocation6 + $0x1f0] sm:$0xff]  ;;  %v96_v8 = vld [vmem:[#allocation6 + $0x68] sm:$0xff]  ;;  %s572_s26 = scalar_lea.vmem %s388_s25, 128  ;;  %p577_p11 = scmp.lt.s32.totalorder %s388_s25, %s388_s25 }
  0x1f   :  { %v130_v5 = vld [vmem:[#allocation6 + $0x178] sm:$0xff]  ;;  %433 = vmatprep.subr.mxu1 %v146_v3  ;;  %400 = vmatprep.subr.mxu0 %v113_v2  ;;  %v129_v9 = vld [vmem:[#allocation6 + $0x170] sm:$0xff]  ;;  %v144_v10 = vld [vmem:[#allocation6 + $0x1e8] sm:$0xff]  ;;  %p573_p10 = scmp.ne.s32.totalorder %s388_s25, %s572_s26  ;;  %p578_p12 = scmp.lt.s32.totalorder %s572_s26, %s572_s26 }
  0x20   :  { %434 = vmatpush3.msra.mxu1 %v130_v5  ;;  %401 = vmatpush3.msra.mxu0 %v97_v4  ;;  %v111_v11 = vld [vmem:[#allocation6 + $0xe0] sm:$0xff]  ;;  %v128_v12 = vld [vmem:[#allocation6 + $0x168] sm:$0xff]  ;;  %v110_v15 = vld [vmem:[#allocation6 + $0xd8] sm:$0xff]  ;;  %v602_v5 = vmov 0.0  }
  0x21   :  { %435 = vmatprep.subr.mxu1 %v145_v7  ;;  %402 = vmatprep.subr.mxu0 %v112_v6  ;;  %v95_v13 = vld [vmem:[#allocation6 + $0x60] sm:$0xff]  ;;  %v94_v17 = vld [vmem:[#allocation6 + $0x58] sm:$0xff]  ;;  %v109_v19 = vld [vmem:[#allocation6 + $0xd0] sm:$0xff]  ;;  %p579_p13 = por %p578_p12, %p577_p11 }
  0x22   :  { %436 = vmatpush3.msra.mxu1 %v129_v9  ;;  %v143_v14 = vld [vmem:[#allocation6 + $0x1e0] sm:$0xff]  ;;  %403 = vmatpush3.msra.mxu0 %v96_v8  ;;  %v142_v18 = vld [vmem:[#allocation6 + $0x1d8] sm:$0xff]  ;;  %v93_v21 = vld [vmem:[#allocation6 + $0x50] sm:$0xff] }
  0x23   :  { %437 = vmatprep.subr.mxu1 %v144_v10  ;;  %v127_v16 = vld [vmem:[#allocation6 + $0x160] sm:$0xff]  ;;  %404 = vmatprep.subr.mxu0 %v111_v11  ;;  %v126_v20 = vld [vmem:[#allocation6 + $0x158] sm:$0xff]  ;;  %v141_v22 = vld [vmem:[#allocation6 + $0x1d0] sm:$0xff]  ;;  %p580_p0 = pnand %p579_p13, %p573_p10 }
  0x24   :  { %438 = vmatpush3.msra.mxu1 %v128_v12  ;;  %405 = vmatpush3.msra.mxu0 %v95_v13  ;;  %v108_v23 = vld [vmem:[#allocation6 + $0xc8] sm:$0xff]  ;;  %v125_v24 = vld [vmem:[#allocation6 + $0x150] sm:$0xff]  ;;  %v107_v27 = vld [vmem:[#allocation6 + $0xc0] sm:$0xff] }
  0x25   :  { %439 = vmatprep.subr.mxu1 %v143_v14  ;;  %406 = vmatprep.subr.mxu0 %v110_v15  ;;  %v92_v25 = vld [vmem:[#allocation6 + $0x48] sm:$0xff]  ;;  %v91_v29 = vld [vmem:[#allocation6 + $0x40] sm:$0xff]  ;;  %v106_v31 = vld [vmem:[#allocation6 + $0xb8] sm:$0xff] }
  0x26   :  { %440 = vmatpush3.msra.mxu1 %v127_v16  ;;  %407 = vmatpush3.msra.mxu0 %v94_v17  ;;  %v140_v26 = vld [vmem:[#allocation6 + $0x1c8] sm:$0xff]  ;;  %v139_v30 = vld [vmem:[#allocation6 + $0x1c0] sm:$0xff]  ;;  %v90_v33 = vld [vmem:[#allocation6 + $0x38] sm:$0xff] }
  0x27   :  { %441 = vmatprep.subr.mxu1 %v142_v18  ;;  %408 = vmatprep.subr.mxu0 %v109_v19  ;;  %v124_v28 = vld [vmem:[#allocation6 + $0x148] sm:$0xff]  ;;  %v123_v32 = vld [vmem:[#allocation6 + $0x140] sm:$0xff]  ;;  %v138_v34 = vld [vmem:[#allocation6 + $0x1b8] sm:$0xff] }
  0x28   :  { %442 = vmatpush3.msra.mxu1 %v126_v20  ;;  %409 = vmatpush3.msra.mxu0 %v93_v21  ;;  %v105_v35 = vld [vmem:[#allocation6 + $0xb0] sm:$0xff]  ;;  %v122_v36 = vld [vmem:[#allocation6 + $0x138] sm:$0xff]  ;;  %v104_v39 = vld [vmem:[#allocation6 + $0xa8] sm:$0xff] }
  0x29   :  { %443 = vmatprep.subr.mxu1 %v141_v22  ;;  %410 = vmatprep.subr.mxu0 %v108_v23  ;;  %v89_v37 = vld [vmem:[#allocation6 + $0x30] sm:$0xff]  ;;  %v88_v40 = vld [vmem:[#allocation6 + $0x28] sm:$0xff]  ;;  %v103_v42 = vld [vmem:[#allocation6 + $0xa0] sm:$0xff] }
  0x2a   :  { %444 = vmatpush3.msra.mxu1 %v125_v24  ;;  %411 = vmatpush3.msra.mxu0 %v92_v25  ;;  %v137_v38 = vld [vmem:[#allocation6 + $0x1b0] sm:$0xff]  ;;  %v136_v43 = vld [vmem:[#allocation6 + $0x1a8] sm:$0xff]  ;;  %v87_v44 = vld [vmem:[#allocation6 + $0x20] sm:$0xff] }
  0x2b   :  { %445 = vmatprep.subr.mxu1 %v140_v26  ;;  %412 = vmatprep.subr.mxu0 %v107_v27  ;;  %v121_v41 = vld [vmem:[#allocation6 + $0x130] sm:$0xff]  ;;  %v120_v45 = vld [vmem:[#allocation6 + $0x128] sm:$0xff]  ;;  %v102_v46 = vld [vmem:[#allocation6 + $0x98] sm:$0xff] }
  0x2c   :  { %446 = vmatpush3.msra.mxu1 %v124_v28  ;;  %413 = vmatpush3.msra.mxu0 %v91_v29  ;;  %v135_v47 = vld [vmem:[#allocation6 + $0x1a0] sm:$0xff]  ;;  %v86_v48 = vld [vmem:[#allocation6 + $0x18] sm:$0xff]  ;;  %v101_v51 = vld [vmem:[#allocation6 + $0x90] sm:$0xff] }
  0x2d   :  { %447 = vmatprep.subr.mxu1 %v139_v30  ;;  %414 = vmatprep.subr.mxu0 %v106_v31  ;;  %v119_v49 = vld [vmem:[#allocation6 + $0x120] sm:$0xff]  ;;  %v134_v50 = vld [vmem:[#allocation6 + $0x198] sm:$0xff]  ;;  %v85_v53 = vld [vmem:[#allocation6 + $0x10] sm:$0xff] }
  0x2e   :  { %448 = vmatpush3.msra.mxu1 %v123_v32  ;;  %415 = vmatpush3.msra.mxu0 %v90_v33  ;;  %v118_v52 = vld [vmem:[#allocation6 + $0x118] sm:$0xff]  ;;  %v133_v54 = vld [vmem:[#allocation6 + $0x190] sm:$0xff]  ;;  %v100_v55 = vld [vmem:[#allocation6 + $0x88] sm:$0xff] }
  0x2f   :  { %449 = vmatprep.subr.mxu1 %v138_v34  ;;  %416 = vmatprep.subr.mxu0 %v105_v35  ;;  %v117_v56 = vld [vmem:[#allocation6 + $0x110] sm:$0xff]  ;;  %v84_v57 = vld [vmem:[#allocation6 + $0x8] sm:$0xff]  ;;  %v99_v60 = vld [vmem:[#allocation6 + $0x80] sm:$0xff] }
  0x30   :  { %450 = vmatpush3.msra.mxu1 %v122_v36  ;;  %417 = vmatpush3.msra.mxu0 %v89_v37  ;;  %v132_v58 = vld [vmem:[#allocation6 + $0x188] sm:$0xff]  ;;  %v527_v59 = vld [vmem:[#allocation3 + $0x1] ss:$8 sps:$4 sm:$0xff]   ;;  %v83_v61 = vld [vmem:[#allocation6] sm:$0xff] }
  0x31   :  { %451 = vmatprep.subr.mxu1 %v137_v38  ;;  %418 = vmatprep.subr.mxu0 %v104_v39  ;;  %v116_v62 = vld [vmem:[#allocation6 + $0x108] sm:$0xff]  ;;  %v528_v63 = vld [vmem:[#allocation3] ss:$8 sps:$4 sm:$0xff]   ;;  %v131_v0 = vld [vmem:[#allocation6 + $0x180] sm:$0xff] }
  0x32   :  { %452 = vmatpush3.msra.mxu1 %v121_v41  ;;  %419 = vmatpush3.msra.mxu0 %v88_v40  ;;  %v115_v1 = vld [vmem:[#allocation6 + $0x100] sm:$0xff]  ;;  %v529_v2 = vld [vmem:[#allocation3 + $0x3] ss:$8 sps:$4 sm:$0xff]   ;;  %v160_v7 = vld [vmem:[#allocation6 + $0x268] sm:$0xff] }
  0x33   :  { %453 = vmatprep.subr.mxu1 %v136_v43  ;;  %420 = vmatprep.subr.mxu0 %v103_v42  ;;  %v162_v3 = vld [vmem:[#allocation6 + $0x278] sm:$0xff]  ;;  %v161_v6 = vld [vmem:[#allocation6 + $0x270] sm:$0xff]  ;;  %v159_v8 = vld [vmem:[#allocation6 + $0x260] sm:$0xff] }
  0x34   :  { %454 = vmatpush3.msra.mxu1 %v120_v45  ;;  %421 = vmatpush3.msra.mxu0 %v87_v44  ;;  %v530_v4 = vld [vmem:[#allocation3 + $0x2] ss:$8 sps:$4 sm:$0xff]   ;;  %v156_v11 = vld [vmem:[#allocation6 + $0x248] sm:$0xff]  ;;  %v155_v12 = vld [vmem:[#allocation6 + $0x240] sm:$0xff] }
  0x35   :  { %455 = vmatprep.subr.mxu1 %v135_v47  ;;  %422 = vmatprep.subr.mxu0 %v102_v46  ;;  %v158_v9 = vld [vmem:[#allocation6 + $0x258] sm:$0xff]  ;;  %v157_v10 = vld [vmem:[#allocation6 + $0x250] sm:$0xff]  ;;  %v152_v15 = vld [vmem:[#allocation6 + $0x228] sm:$0xff] }
  0x36   :  { %456 = vmatpush3.msra.mxu1 %v119_v49  ;;  %423 = vmatpush3.msra.mxu0 %v86_v48  ;;  %v154_v13 = vld [vmem:[#allocation6 + $0x238] sm:$0xff]  ;;  %v153_v14 = vld [vmem:[#allocation6 + $0x230] sm:$0xff]  ;;  %v151_v16 = vld [vmem:[#allocation6 + $0x220] sm:$0xff] }
  0x37   :  { %457 = vmatprep.subr.mxu1 %v134_v50  ;;  %424 = vmatprep.subr.mxu0 %v101_v51  ;;  %v150_v17 = vld [vmem:[#allocation6 + $0x218] sm:$0xff]  ;;  %v149_v18 = vld [vmem:[#allocation6 + $0x210] sm:$0xff]  ;;  %v148_v19 = vld [vmem:[#allocation6 + $0x208] sm:$0xff] }
  0x38   :  { %458 = vmatpush3.msra.mxu1 %v118_v52  ;;  %425 = vmatpush3.msra.mxu0 %v85_v53  ;;  %v147_v20 = vld [vmem:[#allocation6 + $0x200] sm:$0xff]  ;;  %v531_v21 = vld [vmem:[#allocation3 + $0x4] ss:$8 sps:$4 sm:$0xff]   ;;  %v397_v26 = vld [vmem:[%s639_s2] ss:$0 sm:$0xff] }
  0x39   :  { %459 = vmatprep.subr.mxu1 %v133_v54  ;;  %426 = vmatprep.subr.mxu0 %v100_v55 }
  0x3a   :  { %460 = vmatpush3.msra.mxu1 %v117_v56  ;;  %427 = vmatpush3.msra.mxu0 %v84_v57 }
  0x3b   :  { %461 = vmatprep.subr.mxu1 %v132_v58  ;;  %428 = vmatprep.subr.mxu0 %v99_v60 }
  0x3c   :  { %234 = vmatprep.mubr.f32.mxu0 %v527_v59  ;;  %429 = vmatpush3.msra.mxu0 %v83_v61 }
  0x3d   :  { %462 = vmatpush3.msra.mxu1 %v116_v62  ;;  %235 = vmatmul.mubr.f32.vlgmr.msra.gmra.mxu0 %v528_v63 }
  0x3e   :  { %463 = vmatprep.subr.mxu1 %v131_v0  ;;  %485 = vmatprep.subr.mxu0 %v602_v5 }
  0x3f   :  { %464 = vmatpush3.msra.mxu1 %v115_v1  ;;  %304 = vmatprep.mubr.f32.mxu1 %v529_v2 }
  0x40   :  { %486 = vmatpush3.msra.mxu0 %v162_v3  ;;  %305 = vmatmul.mubr.f32.vlgmr.msra.gmra.mxu1 %v530_v4 }
  0x41   :  { %487 = vmatprep.subr.mxu0 %v602_v5  ;;  %517 = vmatprep.mubr.msk.f32.mxu0 %vm603_vm0, %v602_v5 }
  0x42   :  { %488 = vmatpush3.msra.mxu0 %v161_v6 }
  0x43   :  { %489 = vmatprep.subr.mxu0 %v602_v5 }
  0x44   :  { %490 = vmatpush3.msra.mxu0 %v160_v7 }
  0x45   :  { %491 = vmatprep.subr.mxu0 %v602_v5 }
  0x46   :  { %492 = vmatpush3.msra.mxu0 %v159_v8 }
  0x47   :  { %493 = vmatprep.subr.mxu0 %v602_v5 }
  0x48   :  { %494 = vmatpush3.msra.mxu0 %v158_v9 }
  0x49   :  { %495 = vmatprep.subr.mxu0 %v602_v5 }
  0x4a   :  { %496 = vmatpush3.msra.mxu0 %v157_v10 }
  0x4b   :  { %497 = vmatprep.subr.mxu0 %v602_v5 }
  0x4c   :  { %498 = vmatpush3.msra.mxu0 %v156_v11 }
  0x4d   :  { %499 = vmatprep.subr.mxu0 %v602_v5 }
  0x4e   :  { %500 = vmatpush3.msra.mxu0 %v155_v12 }
  0x4f   :  { %501 = vmatprep.subr.mxu0 %v602_v5 }
  0x50   :  { %502 = vmatpush3.msra.mxu0 %v154_v13 }
  0x51   :  { %503 = vmatprep.subr.mxu0 %v602_v5 }
  0x52   :  { %504 = vmatpush3.msra.mxu0 %v153_v14 }
  0x53   :  { %505 = vmatprep.subr.mxu0 %v602_v5 }
  0x54   :  { %506 = vmatpush3.msra.mxu0 %v152_v15 }
  0x55   :  { %507 = vmatprep.subr.mxu0 %v602_v5 }
  0x56   :  { %508 = vmatpush3.msra.mxu0 %v151_v16 }
  0x57   :  { %509 = vmatprep.subr.mxu0 %v602_v5 }
  0x58   :  { %510 = vmatpush3.msra.mxu0 %v150_v17 }
  0x59   :  { %511 = vmatprep.subr.mxu0 %v602_v5 }
  0x5a   :  { %512 = vmatpush3.msra.mxu0 %v149_v18 }
  0x5b   :  { %513 = vmatprep.subr.mxu0 %v602_v5 }
  0x5c   :  { %514 = vmatpush3.msra.mxu0 %v148_v19 }
  0x5d   :  { %515 = vmatprep.subr.mxu0 %v602_v5 }
  0x5e   :  { %516 = vmatpush3.msra.mxu0 %v147_v20 }
  0x5f   :  { %518 = vmatmul.mubr.f32.vlgmr.msra.gmra.mxu0 %v531_v21 }
  0xfd   :  { %v430_v22 = vpop.f32.mrf.mxu0 }
  0xff   :  { %v431_v23 = vpop.f32.mrf.mxu0 }
 0x100   :  { %v465_v24 = vpop.f32.mrf.mxu1  ;;  %v432_v25 = vadd.f32 %v431_v23, %v430_v22 }
 0x102   :  { %v466_v27 = vpop.f32.mrf.mxu1  ;;  %v237_v28 = vadd.f32 %v432_v25, %v397_v26 }
 0x103   :  { %v467_v29 = vadd.f32 %v466_v27, %v465_v24 }
 0x105   :  { %v307_v30 = vadd.f32 %v467_v29, %v237_v28 }
 0x11f   :  { %v376_v31 = vpop.f32.mrf.mxu0 }
 0x120   :  { %v377_v32 = vadd.f32 %v376_v31, %v307_v30 }
 0x121   :  { %v519_v33 = vpop.f32.mrf.mxu0 }
 0x122   :  { %380 = vst [vmem:[#allocation8] sm:$0xff] %v377_v32 }
 0x123   :  { %583 = shalt.err (!%p580_p0)
}
 0x124   :  { %390 = dma.vmem_to_hbm [thread:$0]  %s388_s25, 128, %s640_s3, [#allocation5]  }
 0x125   :  { %596 = dma.done.wait [#allocation5], 128  }
 0x126   :  { %597 = vsyncadd [#allocation5], 4294967168 }
 0x127   :  { %394 = vsyncpa [#allocation4], 1 }
 0x128   :  { %395 = vsyncpa [#allocation7], 1 }
 0x129   :  { %396 = vsyncpa [#allocation5], 1 }

</bundles_post_ra>
